<compile_context>
chip_gen: v6e
topology: v6e:2x2x1
jax: 0.10.0
libtpu: 0.0.40
codegen_flags: <defaults>
</compile_context>

<pallas_src>
import math

import jax
import jax.numpy as jnp
from jax.experimental import pallas as pl
from jax.experimental.pallas import tpu as pltpu

LANE = 128   # TPU lane width (batch tile sits on lanes)
SUB = 8      # TPU sublane count (output rows padded to 8)


def _round_up(x, m):
    return ((x + m - 1) // m) * m


def ffnn_kernel(ids_ref, projT_ref, ww_ref, wb_ref, out_ref):
    """One batch tile, batch on the lane axis.

    ids_ref  : [S, TB]   int32  token ids for this tile (batch = lanes)
    projT_ref: [H, V]    f32    ((emb_table @ V.w^T + V.b) / S)^T   (grid-resident)
    ww_ref   : [SUB, H]  f32    W.w zero-padded to 8 output rows     (grid-resident)
    wb_ref   : [SUB, 1]  f32    W.b zero-padded                      (grid-resident)
    out_ref  : [SUB, TB] f32    transposed lane-dense output slab (rows >= O are 0)
    """
    s_len, tb = ids_ref.shape
    vocab = projT_ref.shape[1]

    # Fused "gather": counts[v, b] = #{s : ids[s, b] == v}, so
    #   sum_s proj[ids[s, b], :]  ==  proj^T @ counts   (one MXU matmul).
    viota = jax.lax.broadcasted_iota(jnp.int32, (vocab, tb), 0)     # [V, TB]

    def body(s, counts):
        row = ids_ref[pl.ds(s, 1), :]                               # [1, TB]
        return counts + (viota == row).astype(jnp.float32)

    counts = jax.lax.fori_loop(0, s_len, body,
                               jnp.zeros((vocab, tb), jnp.float32),
                               unroll=True)                         # [V, TB]

    # h^T = tanh(proj^T @ counts)   (1/S mean scale and V.b folded into proj)
    hT = jnp.tanh(jnp.dot(projT_ref[...], counts,
                          preferred_element_type=jnp.float32))      # [H, TB]
    # out^T = W.w @ h^T + W.b
    outT = jnp.dot(ww_ref[...], hT,
                   preferred_element_type=jnp.float32) + wb_ref[...]
    out_ref[...] = outT.astype(out_ref.dtype)


def fold_ffnn_params(emb_table, v_w, v_b, w_w, w_b, seq_len):
    """One-time algebraic fold (hoisted out of the per-call forward):
         mean(emb(x)) @ V.w^T + V.b  ==  sum_s projT[:, x_s]
    Done at HIGHEST precision so the fold does not add matmul rounding error.
    """
    hi = jax.lax.Precision.HIGHEST
    H = v_w.shape[0]
    O = w_w.shape[0]
    projT = (jnp.dot(v_w.astype(jnp.float32),
                     emb_table.astype(jnp.float32).T, precision=hi)
             + v_b.astype(jnp.float32)[:, None]) / float(seq_len)     # [H, V]
    ww_pad = jnp.zeros((SUB, H), jnp.float32).at[:O, :].set(
        w_w.astype(jnp.float32))                                      # [SUB, H]
    wb_pad = jnp.zeros((SUB, 1), jnp.float32).at[:O, 0].set(
        w_b.astype(jnp.float32))                                      # [SUB, 1]
    return projT, ww_pad, wb_pad


def ffnn_forward(token_ids, projT, ww_pad, wb_pad, *, out_dim, tb=None):
    """token_ids: [B, S] int32, projT/ww_pad/wb_pad from fold_ffnn_params.
    Returns [B, out_dim] float32."""
    B, S = token_ids.shape
    H, V = projT.shape

    if tb is None:
        # Grid-step overhead (~0.35 us/step) dominates this kernel, so use big
        # batch tiles: 128 lanes normally; 256 only for very large batches
        # (which still leaves >= 2 blocks so both v7x TensorCores get work).
        bp = _round_up(B, LANE)
        tb = LANE if bp <= 4 * LANE else 2 * LANE
    n_blocks = pl.cdiv(B, tb)
    B_pad = n_blocks * tb

    # Layout plumbing only: batch goes to the lane axis.
    ids_t = token_ids.astype(jnp.int32).T                 # [S, B]
    if B_pad != B:
        ids_t = jnp.pad(ids_t, ((0, 0), (0, B_pad - B)))  # pad with token id 0

    out_t = pl.pallas_call(
        ffnn_kernel,
        out_shape=jax.ShapeDtypeStruct((SUB, B_pad), jnp.float32),
        grid_spec=pltpu.PrefetchScalarGridSpec(
            num_scalar_prefetch=0,
            grid=(n_blocks,),
            in_specs=[
                pl.BlockSpec((S, tb), lambda i: (0, i)),     # token ids tile
                pl.BlockSpec((H, V), lambda i: (0, 0)),      # resident proj^T
                pl.BlockSpec((SUB, H), lambda i: (0, 0)),    # resident W.w (padded)
                pl.BlockSpec((SUB, 1), lambda i: (0, 0)),    # resident W.b (padded)
            ],
            out_specs=pl.BlockSpec((SUB, tb), lambda i: (0, i)),
        ),
        compiler_params=pltpu.CompilerParams(
            dimension_semantics=("parallel",),     # shard batch tiles across TCs
            vmem_limit_bytes=16 * 1024 * 1024,     # footprint is < 1 MiB anyway
        ),
    )(ids_t, projT, ww_pad, wb_pad)

    return out_t[:out_dim, :B].T                   # [B, O]


def xavier_uniform(key, shape):
    fan_out, fan_in = shape
    limit = math.sqrt(6.0 / (fan_in + fan_out))
    return jax.random.uniform(key, shape, jnp.float32, -limit, limit)


if __name__ == "__main__":
    key = jax.random.PRNGKey(0)
    kemb, ktok, kvw, kvb, kww, kwb = jax.random.split(key, 6)

    VOCAB, B, S, INP, HID, OUT = 100, 2, 8, 50, 32, 2

    emb_table = jax.random.normal(kemb, (VOCAB, INP), jnp.float32)
    token_ids = jax.random.randint(ktok, (B, S), 0, VOCAB, jnp.int32)

    # Parameters (torch layouts: Linear weight is [out_features, in_features]).
    v_w = xavier_uniform(kvw, (HID, INP))
    v_b = (jax.random.uniform(kvb, (HID,), jnp.float32) - 0.5) * 2 / math.sqrt(INP)
    w_w = xavier_uniform(kww, (OUT, HID))
    w_b = (jax.random.uniform(kwb, (OUT,), jnp.float32) - 0.5) * 2 / math.sqrt(HID)

    # Fold once (hoisted); reuse for every forward call.
    projT, ww_pad, wb_pad = fold_ffnn_params(emb_table, v_w, v_b, w_w, w_b, S)

    out = ffnn_forward(token_ids, projT, ww_pad, wb_pad, out_dim=OUT)
    out = jax.block_until_ready(out)

    # Pure-JAX reference of the original PyTorch math.
    hi = jax.lax.Precision.HIGHEST
    ref_mean = jnp.mean(jnp.take(emb_table, token_ids, axis=0), axis=1)
    ref = jnp.tanh(jnp.dot(ref_mean, v_w.T, precision=hi) + v_b)
    ref = jnp.dot(ref, w_w.T, precision=hi) + w_b
    assert out.shape == (B, OUT)
    assert jnp.allclose(out, ref, atol=1e-4, rtol=1e-4), (out, ref)

    print("KERNEL_OK")
</pallas_src>

<mosaic_0001>
module attributes {stable_mosaic.version = 11 : i64} {
  func.func @ffnn_kernel(%arg0: i32, %arg1: memref<8x128xi32, #tpu.memory_space<vmem>>, %arg2: memref<32x100xf32, #tpu.memory_space<vmem>>, %arg3: memref<8x32xf32, #tpu.memory_space<vmem>>, %arg4: memref<8x1xf32, #tpu.memory_space<vmem>>, %arg5: memref<8x128xf32, #tpu.memory_space<vmem>>) attributes {dimension_semantics = [#tpu.dimension_semantics<parallel>], iteration_bounds = array<i64: 1>, scalar_prefetch = 0 : i64, scratch_operands = 0 : i64, tpu.core_type = #tpu.core_type<tc>, window_params = [{transform_indices = @transform_0, window_bounds = array<i64: 8, 128>}, {pipeline_mode = #tpu.pipeline_mode<synchronous>, transform_indices = @transform_1, window_bounds = array<i64: 32, 100>}, {pipeline_mode = #tpu.pipeline_mode<synchronous>, transform_indices = @transform_2, window_bounds = array<i64: 8, 32>}, {pipeline_mode = #tpu.pipeline_mode<synchronous>, transform_indices = @transform_3, window_bounds = array<i64: 8, 1>}, {transform_indices = @transform_4, window_bounds = array<i64: 8, 128>}]} {
    %0 = tpu.iota {dimensions = array<i32: 0>} : vector<100x128xi32>
    %cst = arith.constant 0.000000e+00 : f32
    %1 = vector.broadcast %cst : f32 to vector<100x128xf32>
    %c0_i32 = arith.constant 0 : i32
    %2 = arith.index_cast %c0_i32 : i32 to index
    %c0 = arith.constant 0 : index
    %3 = vector.load %arg1[%2, %c0] : memref<8x128xi32, #tpu.memory_space<vmem>>, vector<1x128xi32>
    %4 = vector.broadcast %3 : vector<1x128xi32> to vector<100x128xi32>
    %5 = arith.cmpi eq, %0, %4 : vector<100x128xi32>
    %6 = arith.extui %5 : vector<100x128xi1> to vector<100x128xi32>
    %7 = arith.sitofp %6 : vector<100x128xi32> to vector<100x128xf32>
    %8 = arith.addf %1, %7 : vector<100x128xf32>
    %c1_i32 = arith.constant 1 : i32
    %9 = arith.index_cast %c1_i32 : i32 to index
    %c0_0 = arith.constant 0 : index
    %10 = vector.load %arg1[%9, %c0_0] : memref<8x128xi32, #tpu.memory_space<vmem>>, vector<1x128xi32>
    %11 = vector.broadcast %10 : vector<1x128xi32> to vector<100x128xi32>
    %12 = arith.cmpi eq, %0, %11 : vector<100x128xi32>
    %13 = arith.extui %12 : vector<100x128xi1> to vector<100x128xi32>
    %14 = arith.sitofp %13 : vector<100x128xi32> to vector<100x128xf32>
    %15 = arith.addf %8, %14 : vector<100x128xf32>
    %c2_i32 = arith.constant 2 : i32
    %16 = arith.index_cast %c2_i32 : i32 to index
    %c0_1 = arith.constant 0 : index
    %17 = vector.load %arg1[%16, %c0_1] : memref<8x128xi32, #tpu.memory_space<vmem>>, vector<1x128xi32>
    %18 = vector.broadcast %17 : vector<1x128xi32> to vector<100x128xi32>
    %19 = arith.cmpi eq, %0, %18 : vector<100x128xi32>
    %20 = arith.extui %19 : vector<100x128xi1> to vector<100x128xi32>
    %21 = arith.sitofp %20 : vector<100x128xi32> to vector<100x128xf32>
    %22 = arith.addf %15, %21 : vector<100x128xf32>
    %c3_i32 = arith.constant 3 : i32
    %23 = arith.index_cast %c3_i32 : i32 to index
    %c0_2 = arith.constant 0 : index
    %24 = vector.load %arg1[%23, %c0_2] : memref<8x128xi32, #tpu.memory_space<vmem>>, vector<1x128xi32>
    %25 = vector.broadcast %24 : vector<1x128xi32> to vector<100x128xi32>
    %26 = arith.cmpi eq, %0, %25 : vector<100x128xi32>
    %27 = arith.extui %26 : vector<100x128xi1> to vector<100x128xi32>
    %28 = arith.sitofp %27 : vector<100x128xi32> to vector<100x128xf32>
    %29 = arith.addf %22, %28 : vector<100x128xf32>
    %c4_i32 = arith.constant 4 : i32
    %30 = arith.index_cast %c4_i32 : i32 to index
    %c0_3 = arith.constant 0 : index
    %31 = vector.load %arg1[%30, %c0_3] : memref<8x128xi32, #tpu.memory_space<vmem>>, vector<1x128xi32>
    %32 = vector.broadcast %31 : vector<1x128xi32> to vector<100x128xi32>
    %33 = arith.cmpi eq, %0, %32 : vector<100x128xi32>
    %34 = arith.extui %33 : vector<100x128xi1> to vector<100x128xi32>
    %35 = arith.sitofp %34 : vector<100x128xi32> to vector<100x128xf32>
    %36 = arith.addf %29, %35 : vector<100x128xf32>
    %c5_i32 = arith.constant 5 : i32
    %37 = arith.index_cast %c5_i32 : i32 to index
    %c0_4 = arith.constant 0 : index
    %38 = vector.load %arg1[%37, %c0_4] : memref<8x128xi32, #tpu.memory_space<vmem>>, vector<1x128xi32>
    %39 = vector.broadcast %38 : vector<1x128xi32> to vector<100x128xi32>
    %40 = arith.cmpi eq, %0, %39 : vector<100x128xi32>
    %41 = arith.extui %40 : vector<100x128xi1> to vector<100x128xi32>
    %42 = arith.sitofp %41 : vector<100x128xi32> to vector<100x128xf32>
    %43 = arith.addf %36, %42 : vector<100x128xf32>
    %c6_i32 = arith.constant 6 : i32
    %44 = arith.index_cast %c6_i32 : i32 to index
    %c0_5 = arith.constant 0 : index
    %45 = vector.load %arg1[%44, %c0_5] : memref<8x128xi32, #tpu.memory_space<vmem>>, vector<1x128xi32>
    %46 = vector.broadcast %45 : vector<1x128xi32> to vector<100x128xi32>
    %47 = arith.cmpi eq, %0, %46 : vector<100x128xi32>
    %48 = arith.extui %47 : vector<100x128xi1> to vector<100x128xi32>
    %49 = arith.sitofp %48 : vector<100x128xi32> to vector<100x128xf32>
    %50 = arith.addf %43, %49 : vector<100x128xf32>
    %c7_i32 = arith.constant 7 : i32
    %51 = arith.index_cast %c7_i32 : i32 to index
    %c0_6 = arith.constant 0 : index
    %52 = vector.load %arg1[%51, %c0_6] : memref<8x128xi32, #tpu.memory_space<vmem>>, vector<1x128xi32>
    %53 = vector.broadcast %52 : vector<1x128xi32> to vector<100x128xi32>
    %54 = arith.cmpi eq, %0, %53 : vector<100x128xi32>
    %55 = arith.extui %54 : vector<100x128xi1> to vector<100x128xi32>
    %56 = arith.sitofp %55 : vector<100x128xi32> to vector<100x128xf32>
    %57 = arith.addf %50, %56 : vector<100x128xf32>
    %c8_i32 = arith.constant 8 : i32
    %c0_7 = arith.constant 0 : index
    %c0_8 = arith.constant 0 : index
    %58 = vector.load %arg2[%c0_7, %c0_8] : memref<32x100xf32, #tpu.memory_space<vmem>>, vector<32x100xf32>
    %cst_9 = arith.constant dense<0.000000e+00> : vector<32x128xf32>
    %59 = tpu.matmul %58, %57, %cst_9 {dimension_numbers = #tpu.dot_dimension_numbers<[1], [0], [0], [1], [0, 0, 1, 1], [], []>} : vector<32x100xf32>, vector<100x128xf32>, vector<32x128xf32> -> vector<32x128xf32>
    %60 = math.tanh %59 : vector<32x128xf32>
    %c0_10 = arith.constant 0 : index
    %c0_11 = arith.constant 0 : index
    %61 = vector.load %arg3[%c0_10, %c0_11] : memref<8x32xf32, #tpu.memory_space<vmem>>, vector<8x32xf32>
    %cst_12 = arith.constant dense<0.000000e+00> : vector<8x128xf32>
    %62 = tpu.matmul %61, %60, %cst_12 {dimension_numbers = #tpu.dot_dimension_numbers<[1], [0], [0], [1], [0, 0, 1, 1], [], []>} : vector<8x32xf32>, vector<32x128xf32>, vector<8x128xf32> -> vector<8x128xf32>
    %c0_13 = arith.constant 0 : index
    %c0_14 = arith.constant 0 : index
    %63 = vector.load %arg4[%c0_13, %c0_14] : memref<8x1xf32, #tpu.memory_space<vmem>>, vector<8x1xf32>
    %64 = vector.broadcast %63 : vector<8x1xf32> to vector<8x128xf32>
    %65 = arith.addf %62, %64 : vector<8x128xf32>
    %c0_15 = arith.constant 0 : index
    %c0_16 = arith.constant 0 : index
    %66 = vector.load %arg5[%c0_15, %c0_16] : memref<8x128xf32, #tpu.memory_space<vmem>>, vector<8x128xf32>
    tpu.vector_store %arg5[%c0_15, %c0_16], %65 {strides = array<i32>} : memref<8x128xf32, #tpu.memory_space<vmem>>, vector<8x128xf32>,
    return
  }
  func.func @transform_0(%arg0: i32) -> (i32, i32) {
    %c0_i32 = arith.constant 0 : i32
    %c0_i32_0 = arith.constant 0 : i32
    return %c0_i32, %arg0 : i32, i32
  }
  func.func @transform_1(%arg0: i32) -> (i32, i32) {
    %c0_i32 = arith.constant 0 : i32
    %c0_i32_0 = arith.constant 0 : i32
    %c0_i32_1 = arith.constant 0 : i32
    return %c0_i32, %c0_i32_0 : i32, i32
  }
  func.func @transform_2(%arg0: i32) -> (i32, i32) {
    %c0_i32 = arith.constant 0 : i32
    %c0_i32_0 = arith.constant 0 : i32
    %c0_i32_1 = arith.constant 0 : i32
    return %c0_i32, %c0_i32_0 : i32, i32
  }
  func.func @transform_3(%arg0: i32) -> (i32, i32) {
    %c0_i32 = arith.constant 0 : i32
    %c0_i32_0 = arith.constant 0 : i32
    %c0_i32_1 = arith.constant 0 : i32
    return %c0_i32, %c0_i32_0 : i32, i32
  }
  func.func @transform_4(%arg0: i32) -> (i32, i32) {
    %c0_i32 = arith.constant 0 : i32
    %c0_i32_0 = arith.constant 0 : i32
    return %c0_i32, %arg0 : i32, i32
  }
}

</mosaic_0001>

<bundles_post_ra>
// kernel: tpu_custom_call.1
= control target key start
LH: loop header
LB: loop body
LE: loop exit
PB: predicated region body
PF: predicated region fallthrough
CT: control target
= control target key end

     0   :  { %9 = vsyncpa [#allocation3], 0  ;;  %s1469_s0 = inlined_call_operand.vmem [shape: s32[8,128], index: 0, kind: input, shape index: {}]   ;;  %s1470_s1 = inlined_call_operand.hbm [shape: f32[32,100], index: 1, kind: input, shape index: {}]   ;;  %s1471_s2 = inlined_call_operand.hbm [shape: f32[8,32], index: 2, kind: input, shape index: {}]   ;;  %s1472_s3 = inlined_call_operand.vmem [shape: f32[8,1], index: 3, kind: input, shape index: {}]   ;;  %s1473_s4 = inlined_call_operand.hbm [shape: f32[8,128], index: 4, kind: output, shape index: {}]  }
   0x1   :  { %10 = vsyncpa [#allocation6], 0 }
   0x2   :  { %11 = vsyncpa [#allocation4], 0  ;;  %s988_s15 = smov [#allocation2]  }
   0x3   :  { %s19_s16 = sshll.u32 %s988_s15, 4  ;;  %s20_s16 = int_to_ptr.vmem [resolvable:$true] %s19_s16 }
   0x4   :  { %s930_s17 = scalar_lea.vmem %s20_s16, 512  ;;  %p935_p1 = scmp.lt.s32.totalorder %s20_s16, %s20_s16 }
   0x5   :  { %p931_p0 = scmp.ne.s32.totalorder %s20_s16, %s930_s17  ;;  %p936_p2 = scmp.lt.s32.totalorder %s930_s17, %s930_s17 }
   0x7   :  { %p937_p3 = por %p936_p2, %p935_p1 }
   0x9   :  { %p938_p4 = pnand %p937_p3, %p931_p0 }
   0xb   :  { %941 = shalt.err (!%p938_p4)
}
   0xc   :  { %s989_s18 = smov 128   ;;  %s990_s19 = smov 8  }
   0xd   :  { %25 = dma.hbm_to_vmem [thread:$0]  %s1470_s1, 512, %s20_s16, [#allocation3], %s989_s18, %s989_s18, %s990_s19  }
   0xe   :  { %s991_s22 = smov [#allocation5]  }
   0xf   :  { %s32_s23 = sshll.u32 %s991_s22, 4  ;;  %s33_s23 = int_to_ptr.vmem [resolvable:$true] %s32_s23 }
  0x10   :  { %s950_s24 = scalar_lea.vmem %s33_s23, 128  ;;  %p955_p6 = scmp.lt.s32.totalorder %s33_s23, %s33_s23 }
  0x11   :  { %p951_p5 = scmp.ne.s32.totalorder %s33_s23, %s950_s24  ;;  %p956_p7 = scmp.lt.s32.totalorder %s950_s24, %s950_s24 }
  0x13   :  { %p957_p8 = por %p956_p7, %p955_p6 }
  0x15   :  { %p958_p9 = pnand %p957_p8, %p951_p5 }
  0x17   :  { %961 = shalt.err (!%p958_p9)
}
  0x18   :  { %35 = dma.hbm_to_vmem [thread:$0]  %s1471_s2, 128, %s33_s23, [#allocation6]  }
  0x19   :  { %982 = dma.done.wait [#allocation3], 512  }
  0x1a   :  { %983 = vsyncadd [#allocation3], 4294966784 }
  0x1b   :  { %984 = dma.done.wait [#allocation6], 128  }
  0x1c   :  { %985 = vsyncadd [#allocation6], 4294967168  ;;  %v44_v0 = vlaneseq  ;;  %v992_v1 = vmov 0.0   ;;  %vm518_vm0 = vcmask 818176   ;;  %v1061_v13 = vld [vmem:[%s1469_s0] ss:$0 sm:$0xff] }
  0x1d   :  { %894 = vmatprep.subr.mxu1 %v992_v1  ;;  %v1066_v14 = vld [vmem:[%s1469_s0 + $0x1] ss:$0 sm:$0xff]  ;;  %v1071_v15 = vld [vmem:[%s1469_s0 + $0x2] ss:$0 sm:$0xff]  ;;  %v1079_v16 = vld [vmem:[%s1469_s0 + $0x3] ss:$0 sm:$0xff] }
  0x1e   :  { %v1028_v2 = vshrl.u32 %v44_v0, 7  ;;  %v1084_v17 = vld [vmem:[%s1469_s0 + $0x4] ss:$0 sm:$0xff]  ;;  %v1089_v18 = vld [vmem:[%s1469_s0 + $0x5] ss:$0 sm:$0xff]  ;;  %vm531_vm10 = vcmask 1043456  }
  0x1f   :  { %v1100_v22 = vld [vmem:[%s1469_s0 + $0x6] ss:$0 sm:$0xff]  ;;  %v1107_v25 = vld [vmem:[%s1469_s0 + $0x7] ss:$0 sm:$0xff] }
  0x20   :  { %v57_v3 = vadd.s32 96, %v1028_v2  ;;  %v1032_v4 = vadd.s32 88, %v1028_v2  ;;  %v1035_v5 = vadd.s32 80, %v1028_v2  ;;  %v1038_v6 = vadd.s32 72, %v1028_v2  ;;  %v514_v23 = vld [vmem:[#allocation2] sm:$0xff] }
  0x21   :  { %v1041_v7 = vadd.s32 64, %v1028_v2  ;;  %v1044_v8 = vadd.s32 56, %v1028_v2  ;;  %v1047_v9 = vadd.s32 48, %v1028_v2  ;;  %v1050_v10 = vadd.s32 40, %v1028_v2  ;;  %888 = vmatprep.mubr.msk.f32.mxu0 %vm518_vm0, %v514_v23 }
  0x22   :  { %v1053_v11 = vadd.s32 32, %v1028_v2  ;;  %v1056_v12 = vadd.s32 24, %v1028_v2  ;;  %vm75_vm1 = vcmp.eq.s32.totalorder %v57_v3, %v1061_v13  ;;  %vm132_vm2 = vcmp.eq.s32.totalorder %v57_v3, %v1066_v14 }
  0x23   :  { %vm189_vm3 = vcmp.eq.s32.totalorder %v57_v3, %v1071_v15  ;;  %vm74_vm4 = vcmp.eq.s32.totalorder %v1032_v4, %v1061_v13  ;;  %v735_v19 = vsel %vm75_vm1, 1.0, %v992_v1  ;;  %v749_v20 = vsel %vm132_vm2, 1.0, %v992_v1 }
  0x24   :  { %v763_v21 = vsel %vm189_vm3, 1.0, %v992_v1  ;;  %vm246_vm5 = vcmp.eq.s32.totalorder %v57_v3, %v1079_v16  ;;  %v171_v24 = vadd.f32 %v749_v20, %v735_v19  ;;  %vm303_vm6 = vcmp.eq.s32.totalorder %v57_v3, %v1084_v17 }
  0x25   :  { %vm360_vm7 = vcmp.eq.s32.totalorder %v57_v3, %v1089_v18  ;;  %v1110_v26 = vadd.s32 16, %v1028_v2  ;;  %v777_v27 = vsel %vm246_vm5, 1.0, %v992_v1  ;;  %v791_v28 = vsel %vm303_vm6, 1.0, %v992_v1 }
  0x26   :  { %vm417_vm8 = vcmp.eq.s32.totalorder %v57_v3, %v1100_v22  ;;  %v1117_v29 = vadd.s32 8, %v1028_v2  ;;  %v228_v30 = vadd.f32 %v763_v21, %v171_v24  ;;  %v805_v31 = vsel %vm360_vm7, 1.0, %v992_v1 }
  0x27   :  { %vm474_vm9 = vcmp.eq.s32.totalorder %v57_v3, %v1107_v25  ;;  %v734_v32 = vsel %vm74_vm4, 1.0, %v992_v1  ;;  %vm131_vm11 = vcmp.eq.s32.totalorder %v1032_v4, %v1066_v14  ;;  %vm188_vm12 = vcmp.eq.s32.totalorder %v1032_v4, %v1071_v15 }
  0x28   :  { %vm245_vm13 = vcmp.eq.s32.totalorder %v1032_v4, %v1079_v16  ;;  %vm302_vm14 = vcmp.eq.s32.totalorder %v1032_v4, %v1084_v17  ;;  %v285_v33 = vadd.f32 %v777_v27, %v228_v30  ;;  %v819_v34 = vsel %vm417_vm8, 1.0, %v992_v1 }
  0x29   :  { %v748_v35 = vsel %vm131_vm11, 1.0, %v992_v1  ;;  %v762_v36 = vsel %vm188_vm12, 1.0, %v992_v1  ;;  %v833_v37 = vsel %vm474_vm9, 1.0, %v992_v1  ;;  %v776_v39 = vsel %vm245_vm13, 1.0, %v992_v1 }
  0x2a   :  { %v170_v38 = vadd.f32 %v748_v35, %v734_v32  ;;  %vm359_vm15 = vcmp.eq.s32.totalorder %v1032_v4, %v1089_v18  ;;  %v342_v40 = vadd.f32 %v791_v28, %v285_v33  ;;  %v790_v41 = vsel %vm302_vm14, 1.0, %v992_v1 }
  0x2b   :  { %v804_v42 = vsel %vm359_vm15, 1.0, %v992_v1  ;;  %vm416_vm1 = vcmp.eq.s32.totalorder %v1032_v4, %v1100_v22  ;;  %vm473_vm2 = vcmp.eq.s32.totalorder %v1032_v4, %v1107_v25  ;;  %vm73_vm3 = vcmp.eq.s32.totalorder %v1035_v5, %v1061_v13 }
  0x2c   :  { %v227_v43 = vadd.f32 %v762_v36, %v170_v38  ;;  %vm130_vm4 = vcmp.eq.s32.totalorder %v1035_v5, %v1066_v14  ;;  %v399_v44 = vadd.f32 %v805_v31, %v342_v40  ;;  %v733_v45 = vsel %vm73_vm3, 1.0, %v992_v1 }
  0x2d   :  { %v747_v46 = vsel %vm130_vm4, 1.0, %v992_v1  ;;  %vm187_vm5 = vcmp.eq.s32.totalorder %v1035_v5, %v1071_v15  ;;  %vm244_vm6 = vcmp.eq.s32.totalorder %v1035_v5, %v1079_v16  ;;  %vm301_vm7 = vcmp.eq.s32.totalorder %v1035_v5, %v1084_v17 }
  0x2e   :  { %v284_v47 = vadd.f32 %v776_v39, %v227_v43  ;;  %v169_v48 = vadd.f32 %v747_v46, %v733_v45  ;;  %v761_v49 = vsel %vm187_vm5, 1.0, %v992_v1  ;;  %v456_v50 = vadd.f32 %v819_v34, %v399_v44 }
  0x2f   :  { %v775_v51 = vsel %vm244_vm6, 1.0, %v992_v1  ;;  %vm358_vm8 = vcmp.eq.s32.totalorder %v1035_v5, %v1089_v18  ;;  %v818_v53 = vsel %vm416_vm1, 1.0, %v992_v1  ;;  %v832_v54 = vsel %vm473_vm2, 1.0, %v992_v1 }
  0x30   :  { %v341_v52 = vadd.f32 %v790_v41, %v284_v47  ;;  %v226_v55 = vadd.f32 %v761_v49, %v169_v48  ;;  %v513_v56 = vadd.f32 %v833_v37, %v456_v50  ;;  %v789_v57 = vsel %vm301_vm7, 1.0, %v992_v1 }
  0x31   :  { %v803_v58 = vsel %vm358_vm8, 1.0, %v992_v1  ;;  %vm72_vm9 = vcmp.eq.s32.totalorder %v1038_v6, %v1061_v13  ;;  %vm415_vm11 = vcmp.eq.s32.totalorder %v1035_v5, %v1100_v22  ;;  %vm472_vm12 = vcmp.eq.s32.totalorder %v1035_v5, %v1107_v25 }
  0x32   :  { %v398_v59 = vadd.f32 %v804_v42, %v341_v52  ;;  %v283_v60 = vadd.f32 %v775_v51, %v226_v55  ;;  %862 = vmatprep.subr.msk.mxu0 %vm531_vm10, %v513_v56  ;;  %v732_v61 = vsel %vm72_vm9, 1.0, %v992_v1  ;;  %vm129_vm13 = vcmp.eq.s32.totalorder %v1038_v6, %v1066_v14 }
  0x33   :  { %vm186_vm14 = vcmp.eq.s32.totalorder %v1038_v6, %v1071_v15  ;;  %vm243_vm15 = vcmp.eq.s32.totalorder %v1038_v6, %v1079_v16  ;;  %863 = vmatpush3.msk.msra.mxu0 %vm531_vm10, %v513_v56  ;;  %v746_v0 = vsel %vm129_vm13, 1.0, %v992_v1  ;;  %v817_v4 = vsel %vm415_vm11, 1.0, %v992_v1 }
  0x34   :  { %v455_v62 = vadd.f32 %v818_v53, %v398_v59  ;;  %v340_v63 = vadd.f32 %v789_v57, %v283_v60  ;;  %v760_v3 = vsel %vm186_vm14, 1.0, %v992_v1  ;;  %v168_v19 = vadd.f32 %v746_v0, %v732_v61 }
  0x35   :  { %vm300_vm1 = vcmp.eq.s32.totalorder %v1038_v6, %v1084_v17  ;;  %vm357_vm2 = vcmp.eq.s32.totalorder %v1038_v6, %v1089_v18  ;;  %v831_v23 = vsel %vm472_vm12, 1.0, %v992_v1  ;;  %v774_v24 = vsel %vm243_vm15, 1.0, %v992_v1 }
  0x36   :  { %v512_v20 = vadd.f32 %v832_v54, %v455_v62  ;;  %v397_v21 = vadd.f32 %v803_v58, %v340_v63  ;;  %v225_v27 = vadd.f32 %v760_v3, %v168_v19  ;;  %v788_v28 = vsel %vm300_vm1, 1.0, %v992_v1 }
  0x37   :  { %vm414_vm10 = vcmp.eq.s32.totalorder %v1038_v6, %v1100_v22  ;;  %vm71_vm3 = vcmp.eq.s32.totalorder %v1041_v7, %v1061_v13  ;;  %v802_v31 = vsel %vm357_vm2, 1.0, %v992_v1  ;;  %vm471_vm4 = vcmp.eq.s32.totalorder %v1038_v6, %v1107_v25 }
  0x38   :  { %864 = vmatprep.subr.mxu0 %v512_v20  ;;  %v454_v30 = vadd.f32 %v817_v4, %v397_v21  ;;  %v731_v5 = vsel %vm71_vm3, 1.0, %v992_v1  ;;  %v282_v32 = vadd.f32 %v774_v24, %v225_v27  ;;  %vm128_vm5 = vcmp.eq.s32.totalorder %v1041_v7, %v1066_v14 }
  0x39   :  { %865 = vmatpush3.msra.mxu0 %v512_v20  ;;  %vm185_vm6 = vcmp.eq.s32.totalorder %v1041_v7, %v1071_v15  ;;  %vm242_vm7 = vcmp.eq.s32.totalorder %v1041_v7, %v1079_v16  ;;  %v816_v34 = vsel %vm414_vm10, 1.0, %v992_v1  ;;  %v745_v35 = vsel %vm128_vm5, 1.0, %v992_v1 }
  0x3a   :  { %v511_v33 = vadd.f32 %v831_v23, %v454_v30  ;;  %v759_v36 = vsel %vm185_vm6, 1.0, %v992_v1  ;;  %v339_v37 = vadd.f32 %v788_v28, %v282_v32  ;;  %v167_v38 = vadd.f32 %v745_v35, %v731_v5 }
  0x3b   :  { %vm299_vm8 = vcmp.eq.s32.totalorder %v1041_v7, %v1084_v17  ;;  %vm356_vm9 = vcmp.eq.s32.totalorder %v1041_v7, %v1089_v18  ;;  %v830_v39 = vsel %vm471_vm4, 1.0, %v992_v1  ;;  %v773_v40 = vsel %vm242_vm7, 1.0, %v992_v1 }
  0x3c   :  { %866 = vmatprep.subr.mxu0 %v511_v33  ;;  %v787_v41 = vsel %vm299_vm8, 1.0, %v992_v1  ;;  %v801_v42 = vsel %vm356_vm9, 1.0, %v992_v1  ;;  %v396_v43 = vadd.f32 %v802_v31, %v339_v37  ;;  %v224_v44 = vadd.f32 %v759_v36, %v167_v38 }
  0x3d   :  { %867 = vmatpush3.msra.mxu0 %v511_v33  ;;  %vm413_vm11 = vcmp.eq.s32.totalorder %v1041_v7, %v1100_v22  ;;  %vm470_vm12 = vcmp.eq.s32.totalorder %v1041_v7, %v1107_v25  ;;  %vm70_vm13 = vcmp.eq.s32.totalorder %v1044_v8, %v1061_v13  ;;  %vm127_vm14 = vcmp.eq.s32.totalorder %v1044_v8, %v1066_v14 }
  0x3e   :  { %vm184_vm15 = vcmp.eq.s32.totalorder %v1044_v8, %v1071_v15  ;;  %vm241_vm1 = vcmp.eq.s32.totalorder %v1044_v8, %v1079_v16  ;;  %v453_v6 = vadd.f32 %v816_v34, %v396_v43  ;;  %v281_v45 = vadd.f32 %v773_v40, %v224_v44 }
  0x3f   :  { %v730_v46 = vsel %vm70_vm13, 1.0, %v992_v1  ;;  %v744_v47 = vsel %vm127_vm14, 1.0, %v992_v1  ;;  %v815_v48 = vsel %vm413_vm11, 1.0, %v992_v1  ;;  %v758_v50 = vsel %vm184_vm15, 1.0, %v992_v1 }
  0x40   :  { %v166_v49 = vadd.f32 %v744_v47, %v730_v46  ;;  %vm298_vm2 = vcmp.eq.s32.totalorder %v1044_v8, %v1084_v17  ;;  %v510_v51 = vadd.f32 %v830_v39, %v453_v6  ;;  %v338_v52 = vadd.f32 %v787_v41, %v281_v45 }
  0x41   :  { %v772_v53 = vsel %vm241_vm1, 1.0, %v992_v1  ;;  %vm355_vm10 = vcmp.eq.s32.totalorder %v1044_v8, %v1089_v18  ;;  %v829_v54 = vsel %vm470_vm12, 1.0, %v992_v1  ;;  %v786_v56 = vsel %vm298_vm2, 1.0, %v992_v1 }
  0x42   :  { %v223_v55 = vadd.f32 %v758_v50, %v166_v49  ;;  %v800_v57 = vsel %vm355_vm10, 1.0, %v992_v1  ;;  %868 = vmatprep.subr.mxu0 %v510_v51  ;;  %v395_v58 = vadd.f32 %v801_v42, %v338_v52  ;;  %vm412_vm3 = vcmp.eq.s32.totalorder %v1044_v8, %v1100_v22 }
  0x43   :  { %vm469_vm4 = vcmp.eq.s32.totalorder %v1044_v8, %v1107_v25  ;;  %vm69_vm5 = vcmp.eq.s32.totalorder %v1047_v9, %v1061_v13  ;;  %869 = vmatpush3.msra.mxu0 %v510_v51  ;;  %vm126_vm6 = vcmp.eq.s32.totalorder %v1047_v9, %v1066_v14  ;;  %vm183_vm7 = vcmp.eq.s32.totalorder %v1047_v9, %v1071_v15 }
  0x44   :  { %v280_v59 = vadd.f32 %v772_v53, %v223_v55  ;;  %v729_v7 = vsel %vm69_vm5, 1.0, %v992_v1  ;;  %v452_v60 = vadd.f32 %v815_v48, %v395_v58  ;;  %v743_v61 = vsel %vm126_vm6, 1.0, %v992_v1 }
  0x45   :  { %v757_v62 = vsel %vm183_vm7, 1.0, %v992_v1  ;;  %vm240_vm8 = vcmp.eq.s32.totalorder %v1047_v9, %v1079_v16  ;;  %v814_v0 = vsel %vm412_vm3, 1.0, %v992_v1  ;;  %v165_v3 = vadd.f32 %v743_v61, %v729_v7 }
  0x46   :  { %v337_v63 = vadd.f32 %v786_v56, %v280_v59  ;;  %vm297_vm9 = vcmp.eq.s32.totalorder %v1047_v9, %v1084_v17  ;;  %v509_v4 = vadd.f32 %v829_v54, %v452_v60  ;;  %v828_v19 = vsel %vm469_vm4, 1.0, %v992_v1 }
  0x47   :  { %v771_v20 = vsel %vm240_vm8, 1.0, %v992_v1  ;;  %vm354_vm11 = vcmp.eq.s32.totalorder %v1047_v9, %v1089_v18  ;;  %v222_v23 = vadd.f32 %v757_v62, %v165_v3  ;;  %v785_v24 = vsel %vm297_vm9, 1.0, %v992_v1 }
  0x48   :  { %v394_v21 = vadd.f32 %v800_v57, %v337_v63  ;;  %vm411_vm12 = vcmp.eq.s32.totalorder %v1047_v9, %v1100_v22  ;;  %870 = vmatprep.subr.mxu0 %v509_v4  ;;  %v799_v27 = vsel %vm354_vm11, 1.0, %v992_v1  ;;  %vm68_vm13 = vcmp.eq.s32.totalorder %v1050_v10, %v1061_v13 }
  0x49   :  { %vm125_vm14 = vcmp.eq.s32.totalorder %v1050_v10, %v1066_v14  ;;  %vm182_vm15 = vcmp.eq.s32.totalorder %v1050_v10, %v1071_v15  ;;  %871 = vmatpush3.msra.mxu0 %v509_v4  ;;  %v279_v28 = vadd.f32 %v771_v20, %v222_v23  ;;  %vm468_vm1 = vcmp.eq.s32.totalorder %v1047_v9, %v1107_v25 }
  0x4a   :  { %v451_v8 = vadd.f32 %v814_v0, %v394_v21  ;;  %v728_v30 = vsel %vm68_vm13, 1.0, %v992_v1  ;;  %v742_v31 = vsel %vm125_vm14, 1.0, %v992_v1  ;;  %v756_v5 = vsel %vm182_vm15, 1.0, %v992_v1 }
  0x4b   :  { %vm239_vm2 = vcmp.eq.s32.totalorder %v1050_v10, %v1079_v16  ;;  %vm296_vm10 = vcmp.eq.s32.totalorder %v1050_v10, %v1084_v17  ;;  %v336_v33 = vadd.f32 %v785_v24, %v279_v28  ;;  %v813_v34 = vsel %vm411_vm12, 1.0, %v992_v1 }
  0x4c   :  { %v508_v32 = vadd.f32 %v828_v19, %v451_v8  ;;  %v164_v35 = vadd.f32 %v742_v31, %v728_v30  ;;  %v827_v36 = vsel %vm468_vm1, 1.0, %v992_v1  ;;  %v770_v37 = vsel %vm239_vm2, 1.0, %v992_v1 }
  0x4d   :  { %v784_v38 = vsel %vm296_vm10, 1.0, %v992_v1  ;;  %vm353_vm3 = vcmp.eq.s32.totalorder %v1050_v10, %v1089_v18  ;;  %v393_v39 = vadd.f32 %v799_v27, %v336_v33  ;;  %vm410_vm4 = vcmp.eq.s32.totalorder %v1050_v10, %v1100_v22 }
  0x4e   :  { %872 = vmatprep.subr.mxu0 %v508_v32  ;;  %v221_v40 = vadd.f32 %v756_v5, %v164_v35  ;;  %vm467_vm5 = vcmp.eq.s32.totalorder %v1050_v10, %v1107_v25  ;;  %v798_v9 = vsel %vm353_vm3, 1.0, %v992_v1  ;;  %vm67_vm6 = vcmp.eq.s32.totalorder %v1053_v11, %v1061_v13 }
  0x4f   :  { %873 = vmatpush3.msra.mxu0 %v508_v32  ;;  %vm124_vm7 = vcmp.eq.s32.totalorder %v1053_v11, %v1066_v14  ;;  %vm181_vm8 = vcmp.eq.s32.totalorder %v1053_v11, %v1071_v15  ;;  %v450_v41 = vadd.f32 %v813_v34, %v393_v39  ;;  %v727_v43 = vsel %vm67_vm6, 1.0, %v992_v1 }
  0x50   :  { %v278_v42 = vadd.f32 %v770_v37, %v221_v40  ;;  %v741_v44 = vsel %vm124_vm7, 1.0, %v992_v1  ;;  %v755_v45 = vsel %vm181_vm8, 1.0, %v992_v1  ;;  %vm238_vm9 = vcmp.eq.s32.totalorder %v1053_v11, %v1079_v16 }
  0x51   :  { %v163_v6 = vadd.f32 %v741_v44, %v727_v43  ;;  %vm295_vm11 = vcmp.eq.s32.totalorder %v1053_v11, %v1084_v17  ;;  %v507_v46 = vadd.f32 %v827_v36, %v450_v41  ;;  %v812_v48 = vsel %vm410_vm4, 1.0, %v992_v1 }
  0x52   :  { %v335_v47 = vadd.f32 %v784_v38, %v278_v42  ;;  %v769_v49 = vsel %vm238_vm9, 1.0, %v992_v1  ;;  %v826_v50 = vsel %vm467_vm5, 1.0, %v992_v1  ;;  %v783_v52 = vsel %vm295_vm11, 1.0, %v992_v1 }
  0x53   :  { %v220_v51 = vadd.f32 %v755_v45, %v163_v6  ;;  %vm352_vm12 = vcmp.eq.s32.totalorder %v1053_v11, %v1089_v18  ;;  %874 = vmatprep.subr.mxu0 %v507_v46  ;;  %vm409_vm13 = vcmp.eq.s32.totalorder %v1053_v11, %v1100_v22  ;;  %vm466_vm14 = vcmp.eq.s32.totalorder %v1053_v11, %v1107_v25 }
  0x54   :  { %v392_v53 = vadd.f32 %v798_v9, %v335_v47  ;;  %v797_v54 = vsel %vm352_vm12, 1.0, %v992_v1  ;;  %875 = vmatpush3.msra.mxu0 %v507_v46  ;;  %vm66_vm15 = vcmp.eq.s32.totalorder %v1056_v12, %v1061_v13  ;;  %vm123_vm1 = vcmp.eq.s32.totalorder %v1056_v12, %v1066_v14 }
  0x55   :  { %v277_v55 = vadd.f32 %v769_v49, %v220_v51  ;;  %vm180_vm2 = vcmp.eq.s32.totalorder %v1056_v12, %v1071_v15  ;;  %v726_v56 = vsel %vm66_vm15, 1.0, %v992_v1  ;;  %v740_v57 = vsel %vm123_vm1, 1.0, %v992_v1 }
  0x56   :  { %v449_v10 = vadd.f32 %v812_v48, %v392_v53  ;;  %v754_v58 = vsel %vm180_vm2, 1.0, %v992_v1  ;;  %v162_v7 = vadd.f32 %v740_v57, %v726_v56  ;;  %vm237_vm10 = vcmp.eq.s32.totalorder %v1056_v12, %v1079_v16 }
  0x57   :  { %v334_v59 = vadd.f32 %v783_v52, %v277_v55  ;;  %vm294_vm3 = vcmp.eq.s32.totalorder %v1056_v12, %v1084_v17  ;;  %v811_v61 = vsel %vm409_vm13, 1.0, %v992_v1  ;;  %v768_v62 = vsel %vm237_vm10, 1.0, %v992_v1 }
  0x58   :  { %v506_v60 = vadd.f32 %v826_v50, %v449_v10  ;;  %vm351_vm4 = vcmp.eq.s32.totalorder %v1056_v12, %v1089_v18  ;;  %v825_v0 = vsel %vm466_vm14, 1.0, %v992_v1  ;;  %v219_v3 = vadd.f32 %v754_v58, %v162_v7 }
  0x59   :  { %v391_v63 = vadd.f32 %v797_v54, %v334_v59  ;;  %v782_v4 = vsel %vm294_vm3, 1.0, %v992_v1  ;;  %v796_v19 = vsel %vm351_vm4, 1.0, %v992_v1  ;;  %vm408_vm5 = vcmp.eq.s32.totalorder %v1056_v12, %v1100_v22 }
  0x5a   :  { %876 = vmatprep.subr.mxu0 %v506_v60  ;;  %vm65_vm6 = vcmp.eq.s32.totalorder %v1110_v26, %v1061_v13  ;;  %vm122_vm7 = vcmp.eq.s32.totalorder %v1110_v26, %v1066_v14  ;;  %v276_v21 = vadd.f32 %v768_v62, %v219_v3  ;;  %vm465_vm8 = vcmp.eq.s32.totalorder %v1056_v12, %v1107_v25  ;;  %v515_v62 = vld [vmem:[#allocation2 + $0x8] sm:$0xff] }
  0x5b   :  { %877 = vmatpush3.msra.mxu0 %v506_v60  ;;  %v448_v20 = vadd.f32 %v811_v61, %v391_v63  ;;  %v725_v11 = vsel %vm65_vm6, 1.0, %v992_v1  ;;  %v739_v23 = vsel %vm122_vm7, 1.0, %v992_v1  ;;  %vm179_vm9 = vcmp.eq.s32.totalorder %v1110_v26, %v1071_v15  ;;  %v517_v63 = vld [vmem:[#allocation2 + $0x18] sm:$0xff] }
  0x5c   :  { %vm236_vm11 = vcmp.eq.s32.totalorder %v1110_v26, %v1079_v16  ;;  %vm293_vm12 = vcmp.eq.s32.totalorder %v1110_v26, %v1084_v17  ;;  %v333_v27 = vadd.f32 %v782_v4, %v276_v21  ;;  %v161_v8 = vadd.f32 %v739_v23, %v725_v11  ;;  %v624_v23 = vld [vmem:[#allocation5] sm:$0xff] }
  0x5d   :  { %v505_v24 = vadd.f32 %v825_v0, %v448_v20  ;;  %v753_v28 = vsel %vm179_vm9, 1.0, %v992_v1  ;;  %v810_v30 = vsel %vm408_vm5, 1.0, %v992_v1  ;;  %v824_v31 = vsel %vm465_vm8, 1.0, %v992_v1 }
  0x5e   :  { %v767_v5 = vsel %vm236_vm11, 1.0, %v992_v1  ;;  %vm350_vm13 = vcmp.eq.s32.totalorder %v1110_v26, %v1089_v18  ;;  %v390_v32 = vadd.f32 %v796_v19, %v333_v27  ;;  %v218_v33 = vadd.f32 %v753_v28, %v161_v8 }
  0x5f   :  { %878 = vmatprep.subr.mxu0 %v505_v24  ;;  %v781_v34 = vsel %vm293_vm12, 1.0, %v992_v1  ;;  %vm407_vm14 = vcmp.eq.s32.totalorder %v1110_v26, %v1100_v22  ;;  %v795_v35 = vsel %vm350_vm13, 1.0, %v992_v1  ;;  %vm64_vm15 = vcmp.eq.s32.totalorder %v1117_v29, %v1061_v13 }
  0x60   :  { %879 = vmatpush3.msra.mxu0 %v505_v24  ;;  %vm121_vm1 = vcmp.eq.s32.totalorder %v1117_v29, %v1066_v14  ;;  %vm178_vm2 = vcmp.eq.s32.totalorder %v1117_v29, %v1071_v15  ;;  %v447_v12 = vadd.f32 %v810_v30, %v390_v32  ;;  %v275_v36 = vadd.f32 %v767_v5, %v218_v33 }
  0x61   :  { %vm464_vm10 = vcmp.eq.s32.totalorder %v1110_v26, %v1107_v25  ;;  %v724_v37 = vsel %vm64_vm15, 1.0, %v992_v1  ;;  %v738_v38 = vsel %vm121_vm1, 1.0, %v992_v1  ;;  %v752_v39 = vsel %vm178_vm2, 1.0, %v992_v1 }
  0x62   :  { %vm235_vm3 = vcmp.eq.s32.totalorder %v1117_v29, %v1079_v16  ;;  %vm292_vm4 = vcmp.eq.s32.totalorder %v1117_v29, %v1084_v17  ;;  %v504_v40 = vadd.f32 %v824_v31, %v447_v12  ;;  %v332_v9 = vadd.f32 %v781_v34, %v275_v36 }
  0x63   :  { %v160_v41 = vadd.f32 %v738_v38, %v724_v37  ;;  %v809_v42 = vsel %vm407_vm14, 1.0, %v992_v1  ;;  %v823_v43 = vsel %vm464_vm10, 1.0, %v992_v1  ;;  %v766_v44 = vsel %vm235_vm3, 1.0, %v992_v1 }
  0x64   :  { %vm349_vm5 = vcmp.eq.s32.totalorder %v1117_v29, %v1089_v18  ;;  %880 = vmatprep.subr.mxu0 %v504_v40  ;;  %v389_v6 = vadd.f32 %v795_v35, %v332_v9  ;;  %v780_v46 = vsel %vm292_vm4, 1.0, %v992_v1  ;;  %vm406_vm6 = vcmp.eq.s32.totalorder %v1117_v29, %v1100_v22 }
  0x65   :  { %v217_v45 = vadd.f32 %v752_v39, %v160_v41  ;;  %881 = vmatpush3.msra.mxu0 %v504_v40  ;;  %v794_v47 = vsel %vm349_vm5, 1.0, %v992_v1  ;;  %vm63_vm7 = vcmp.eq.s32.totalorder %v1028_v2, %v1061_v13  ;;  %vm120_vm8 = vcmp.eq.s32.totalorder %v1028_v2, %v1066_v14 }
  0x66   :  { %vm177_vm9 = vcmp.eq.s32.totalorder %v1028_v2, %v1071_v15  ;;  %v446_v26 = vadd.f32 %v809_v42, %v389_v6  ;;  %v723_v49 = vsel %vm63_vm7, 1.0, %v992_v1  ;;  %v737_v50 = vsel %vm120_vm8, 1.0, %v992_v1 }
  0x67   :  { %v274_v48 = vadd.f32 %v766_v44, %v217_v45  ;;  %v159_v51 = vadd.f32 %v737_v50, %v723_v49  ;;  %v751_v52 = vsel %vm177_vm9, 1.0, %v992_v1  ;;  %vm234_vm11 = vcmp.eq.s32.totalorder %v1028_v2, %v1079_v16 }
  0x68   :  { %vm291_vm12 = vcmp.eq.s32.totalorder %v1028_v2, %v1084_v17  ;;  %v503_v13 = vadd.f32 %v823_v43, %v446_v26  ;;  %vm463_vm13 = vcmp.eq.s32.totalorder %v1117_v29, %v1107_v25  ;;  %v765_v15 = vsel %vm234_vm11, 1.0, %v992_v1 }
  0x69   :  { %v331_v14 = vadd.f32 %v780_v46, %v274_v48  ;;  %v808_v53 = vsel %vm406_vm6, 1.0, %v992_v1  ;;  %v216_v54 = vadd.f32 %v751_v52, %v159_v51  ;;  %vm348_vm14 = vcmp.eq.s32.totalorder %v1028_v2, %v1089_v18 }
  0x6a   :  { %882 = vmatprep.subr.mxu0 %v503_v13  ;;  %v779_v17 = vsel %vm291_vm12, 1.0, %v992_v1  ;;  %v822_v55 = vsel %vm463_vm13, 1.0, %v992_v1  ;;  %vm405_vm15 = vcmp.eq.s32.totalorder %v1028_v2, %v1100_v22  ;;  %v793_v57 = vsel %vm348_vm14, 1.0, %v992_v1  ;;  %v516_v22 = vld [vmem:[#allocation2 + $0x10] sm:$0xff] }
  0x6b   :  { %v388_v16 = vadd.f32 %v794_v47, %v331_v14  ;;  %883 = vmatpush3.msra.mxu0 %v503_v13  ;;  %v273_v10 = vadd.f32 %v765_v15, %v216_v54  ;;  %vm462_vm1 = vcmp.eq.s32.totalorder %v1028_v2, %v1107_v25  ;;  %v807_v18 = vsel %vm405_vm15, 1.0, %v992_v1  ;;  %v625_v2 = vld [vmem:[%s1472_s3] sm:$0xff]  ;;  %s995_s3 = smov [#allocation7]  }
  0x6c   :  { %v821_v7 = vsel %vm462_vm1, 1.0, %v992_v1  ;;  %vm993_vm2 = vmmov 0   ;;  %v994_v25 = vmov 0   ;;  %s712_s16 = sshll.u32 %s995_s3, 4  ;;  %s713_s16 = int_to_ptr.vmem [resolvable:$true] %s712_s16 }
  0x6d   :  { %v445_v56 = vadd.f32 %v808_v53, %v388_v16  ;;  %v330_v29 = vadd.f32 %v779_v17, %v273_v10  ;;  %902 = vmatprep.mubr.msk.f32.mxu1 %vm993_vm2, %v992_v1  ;;  %913 = vset.pattern.permute.xlu0 %v994_v25  ;;  %s962_s17 = scalar_lea.vmem %s713_s16, 128  ;;  %p967_p11 = scmp.lt.s32.totalorder %s713_s16, %s713_s16 }
  0x6e   :  { %628 = vperm.xlu0 %913, %v625_v2   ;;  %p963_p10 = scmp.ne.s32.totalorder %s713_s16, %s962_s17  ;;  %p968_p12 = scmp.lt.s32.totalorder %s962_s17, %s962_s17 }
  0x6f   :  { %v502_v58 = vadd.f32 %v822_v55, %v445_v56  ;;  %v387_v59 = vadd.f32 %v793_v57, %v330_v29 }
  0x70   :  { %p969_p13 = por %p968_p12, %p967_p11 }
  0x71   :  { %884 = vmatprep.subr.mxu0 %v502_v58  ;;  %v444_v60 = vadd.f32 %v807_v18, %v387_v59 }
  0x72   :  { %885 = vmatpush3.msra.mxu0 %v502_v58  ;;  %p970_p0 = pnand %p969_p13, %p963_p10 }
  0x73   :  { %v501_v61 = vadd.f32 %v821_v7, %v444_v60 }
  0x75   :  { %886 = vmatprep.subr.mxu0 %v501_v61 }
  0x76   :  { %887 = vmatpush3.msra.mxu0 %v501_v61 }
  0x77   :  { %889 = vmatmul.mubr.msk.f32.vlgmr.msra.gmra.mxu0 %vm518_vm0, %v515_v62 }
  0x78   :  { %891 = vmatprep.mubr.msk.f32.mxu0 %vm518_vm0, %v516_v22 }
  0x7b   :  { %892 = vmatmul.mubr.msk.f32.gmra.mxu0 %vm518_vm0, %v517_v63  ;;  %vm631_vm0 = vcmask 261120  }
  0xe9   :  { %v629_v27 = vpop.permute.xlu0 %628 }
 0x137   :  { %v890_v0 = vpop.f32.mrf.mxu0 }
 0x139   :  { %v601_v3 = vpop.f32.mrf.mxu0 }
 0x13b   :  { %v893_v4 = vpop.f32.mrf.mxu0 }
 0x13c   :  { %914 = vtanh.f32 %v893_v4 }
 0x13d   :  { %v611_v19 = vpop.f32.mrf.mxu0 }
 0x13e   :  { %916 = vtanh.f32 %v611_v19 }
 0x13f   :  { %918 = vtanh.f32 %v890_v0 }
 0x140   :  { %920 = vtanh.f32 %v601_v3 }
 0x149   :  { %v915_v20 = vpop.eup %914 }
 0x14a   :  { %895 = vmatpush3.msra.mxu1 %v915_v20 }
 0x14b   :  { %v917_v21 = vpop.eup %916  ;;  %896 = vmatprep.subr.mxu1 %v992_v1 }
 0x14c   :  { %897 = vmatpush3.msra.mxu1 %v917_v21  ;;  %v919_v11 = vpop.eup %918 }
 0x14d   :  { %898 = vmatprep.subr.mxu1 %v992_v1  ;;  %v921_v24 = vpop.eup %920 }
 0x14e   :  { %899 = vmatpush3.msra.mxu1 %v919_v11 }
 0x14f   :  { %900 = vmatprep.subr.mxu1 %v992_v1 }
 0x150   :  { %901 = vmatpush3.msra.mxu1 %v921_v24 }
 0x151   :  { %903 = vmatmul.mubr.msk.f32.vlgmr.msra.gmra.mxu1 %vm631_vm0, %v624_v23 }
 0x211   :  { %v701_v8 = vpop.f32.mrf.mxu1 }
 0x212   :  { %v702_v28 = vadd.f32 %v701_v8, %v629_v27 }
 0x213   :  { %v904_v30 = vpop.f32.mrf.mxu1 }
 0x214   :  { %705 = vst [vmem:[#allocation7] sm:$0xff] %v702_v28 }
 0x215   :  { %973 = shalt.err (!%p970_p0)
}
 0x216   :  { %715 = dma.vmem_to_hbm [thread:$0]  %s713_s16, 128, %s1473_s4, [#allocation4]  }
 0x217   :  { %986 = dma.done.wait [#allocation4], 128  }
 0x218   :  { %987 = vsyncadd [#allocation4], 4294967168 }
 0x219   :  { %719 = vsyncpa [#allocation3], 1 }
 0x21a   :  { %720 = vsyncpa [#allocation6], 1 }
 0x21b   :  { %721 = vsyncpa [#allocation4], 1 }

</bundles_post_ra>
